<compile_context>
chip_gen: v5e
topology: v5e:2x2
jax: 0.10.0
libtpu: 0.0.40
codegen_flags: <defaults>
</compile_context>

<pallas_src>
import functools

import jax
import jax.numpy as jnp
import numpy as np
from jax.experimental import pallas as pl
from jax.experimental.pallas import tpu as pltpu

LANES = 128
MAX_TILE_ROWS = 2048        # 2048x128 f32 block = 1 MiB -> ~2.5 MiB double-buffered
ACC_ROWS = 8                # resident accumulator is (3, 8, 128) per core
_NEG_SENTINEL = -1e4        # exp(-1e4) underflows to 0 -> padded elems contribute 0


def _partial_sums_kernel(x_ref, y_ref, out_ref, *, pos_weight, pw_is_one,
                         fast_sigmoid):
    """Accumulate partial sums into a small resident (3, 8, 128) accumulator.

    out_ref (kernel view (3, 8, 128), float32):
      out[0]: sum of BCE-with-logits elements
      out[1]: sum of sigmoid(x) * y          (dice numerator)
      out[2]: sum of sigmoid(x) + y          (dice denominator)
    """
    t = pl.program_id(1)

    @pl.when(t == 0)
    def _():
        out_ref[...] = jnp.zeros_like(out_ref)

    x = x_ref[...].astype(jnp.float32)
    y = y_ref[...].astype(jnp.float32)

    # Share exp(-|x|) between softplus(+/-x) and sigmoid: 1 exp + 1 log1p / elem.
    e = jnp.exp(-jnp.abs(x))
    log1p_e = jnp.log1p(e)
    sp_pos = jnp.maximum(x, 0.0) + log1p_e                # softplus(x)
    if pw_is_one:
        # softplus(-x) = softplus(x) - x  =>  y*sp(-x) + (1-y)*sp(x) = sp(x) - x*y
        bce_el = sp_pos - x * y
    else:
        sp_neg = jnp.maximum(-x, 0.0) + log1p_e           # softplus(-x), no cancellation
        bce_el = pos_weight * y * sp_neg + (1.0 - y) * sp_pos

    num = jnp.where(x >= 0.0, 1.0, e)
    if fast_sigmoid:
        sig = num * pl.reciprocal(1.0 + e, approx=True)   # EUP slot, off the VALU path
    else:
        sig = num / (1.0 + e)

    rows = x.shape[0]
    groups = rows // ACC_ROWS

    def _acc(i, v):
        # Layout-preserving sublane-group reduction (pure VPU adds): collapse
        # (tile_rows, 128) -> (8, 128) before touching the accumulator, so each
        # grid step performs only 3 accumulator vreg loads + 3 stores.
        out_ref[i] += jnp.sum(v.reshape(groups, ACC_ROWS, LANES), axis=0)

    _acc(0, bce_el)
    _acc(1, sig * y)
    _acc(2, sig + y)


def _sublane_multiple(dtype):
    itemsize = jnp.dtype(dtype).itemsize
    return max(8, 32 // max(1, itemsize))       # f32->8, bf16->16, int8/bool->32


def _tail_sums(x, y, pos_weight):
    """Plain-JAX partial sums for the small unaligned tail."""
    e = jnp.exp(-jnp.abs(x))
    log1p_e = jnp.log1p(e)
    sp_pos = jnp.maximum(x, 0.0) + log1p_e
    sp_neg = jnp.maximum(-x, 0.0) + log1p_e
    bce = jnp.sum(pos_weight * y * sp_neg + (1.0 - y) * sp_pos)
    sig = jnp.where(x >= 0.0, 1.0, e) / (1.0 + e)
    return bce, jnp.sum(sig * y), jnp.sum(sig + y)


def _device_kind():
    try:
        return jax.devices()[0].device_kind.lower()
    except Exception:
        return ""


def _choose_tile_units(units_per_core, max_tile_units):
    """Largest tile (in min_rows units) <= max that leaves the smallest tail."""
    cap = min(max_tile_units, units_per_core)
    floor = max(1, min(cap, max_tile_units // 4))
    best_tu, best_rem = cap, units_per_core % cap
    for tu in range(cap, floor - 1, -1):
        rem = units_per_core % tu
        if rem == 0:
            return tu
        if rem < best_rem:
            best_tu, best_rem = tu, rem
    return best_tu


def _run_body(x2, y2, rows, min_rows, n_cores, pos_weight, pw_is_one, fast_sigmoid):
    """Run the kernel over the largest tileable prefix of `rows` rows.

    Returns (partials of shape (n_cores, 3, 8, 128), body_rows).
    """
    units = rows // min_rows
    units_per_core = units // n_cores
    tu = _choose_tile_units(units_per_core, MAX_TILE_ROWS // min_rows)
    tile_rows = tu * min_rows
    tiles_per_core = units_per_core // tu
    body_rows = n_cores * tiles_per_core * tile_rows

    kernel = functools.partial(_partial_sums_kernel, pos_weight=float(pos_weight),
                               pw_is_one=pw_is_one, fast_sigmoid=fast_sigmoid)
    tpc = tiles_per_core
    in_map = lambda c, t, _tpc=tpc: (c * _tpc + t, 0)

    n_body = body_rows * LANES
    elem_bytes = jnp.dtype(x2.dtype).itemsize + jnp.dtype(y2.dtype).itemsize
    cost = pl.CostEstimate(
        flops=20 * n_body,
        transcendentals=2 * n_body,
        bytes_accessed=n_body * elem_bytes + n_cores * 3 * ACC_ROWS * LANES * 4)

    semantics = ((pltpu.CORE_PARALLEL if n_cores > 1 else pltpu.ARBITRARY),
                 pltpu.ARBITRARY)

    part = pl.pallas_call(
        kernel,
        out_shape=jax.ShapeDtypeStruct((n_cores, 3, ACC_ROWS, LANES), jnp.float32),
        grid_spec=pltpu.PrefetchScalarGridSpec(
            num_scalar_prefetch=0,
            grid=(n_cores, tiles_per_core),
            in_specs=[
                pl.BlockSpec((tile_rows, LANES), in_map),
                pl.BlockSpec((tile_rows, LANES), in_map),
            ],
            out_specs=pl.BlockSpec((None, 3, ACC_ROWS, LANES),
                                   lambda c, t: (c, 0, 0, 0)),
        ),
        compiler_params=pltpu.CompilerParams(
            dimension_semantics=semantics,
            vmem_limit_bytes=32 * 1024 * 1024),
        cost_estimate=cost,
    )(x2, y2)
    return part, body_rows


def ce_dice_combine_loss(output, target, *, weight_bce=1.0, weight_dice=1.0,
                         pos_weight=1.0, smooth=1.0):
    """Pallas TPU implementation of CE_Dice_combine_Loss.forward."""
    assert output.shape == target.shape
    n = int(np.prod(output.shape))

    x = output.reshape(-1)
    y = target.reshape(-1)
    # Stream logits in their native float dtype (bf16 halves HBM bytes);
    # stream integer/bool masks as int8 (1 B/elem) and upcast inside the kernel.
    if x.dtype not in (jnp.float32, jnp.bfloat16):
        x = x.astype(jnp.float32)
    if jnp.issubdtype(y.dtype, jnp.floating):
        if y.dtype not in (jnp.float32, jnp.bfloat16):
            y = y.astype(jnp.float32)
    else:
        y = y.astype(jnp.int8)

    pw = float(pos_weight)
    pw_is_one = (pw == 1.0)
    kind = _device_kind()
    is_v7 = ("v7" in kind) or ("7x" in kind)
    fast_sigmoid = is_v7                   # approx reciprocal only where VALU-bound
    n_cores = 2 if is_v7 else 1            # v5e/v6e have a single TensorCore

    min_rows = max(_sublane_multiple(x.dtype), _sublane_multiple(y.dtype))
    rows = n // LANES

    tail_x = tail_y = None
    if rows < min_rows:
        # Tiny input: pad to one minimal tile with neutral sentinels
        # (x = -1e4, y = 0 contribute exactly 0 to all three partial sums).
        pad = min_rows * LANES - n
        xp = jnp.concatenate([x, jnp.full((pad,), _NEG_SENTINEL, x.dtype)])
        yp = jnp.concatenate([y, jnp.zeros((pad,), y.dtype)])
        x2 = xp.reshape(min_rows, LANES)
        y2 = yp.reshape(min_rows, LANES)
        rows_avail = min_rows
        n_cores = 1
    else:
        if rows * LANES == n:
            x2 = x.reshape(rows, LANES)      # free view, no copy
            y2 = y.reshape(rows, LANES)
        else:
            # TODO(synk): for n not a multiple of 128 this prefix slice copies
            # ~n elements; a flat manual-DMA kernel would avoid that extra pass.
            x2 = x[: rows * LANES].reshape(rows, LANES)
            y2 = y[: rows * LANES].reshape(rows, LANES)
        rows_avail = rows
        if rows // min_rows < n_cores:
            n_cores = 1

    if n_cores > 1:
        try:
            part, body_rows = _run_body(x2, y2, rows_avail, min_rows, n_cores,
                                        pw, pw_is_one, fast_sigmoid)
        except Exception:
            # CORE_PARALLEL not available on this setup -> single-core grid.
            part, body_rows = _run_body(x2, y2, rows_avail, min_rows, 1,
                                        pw, pw_is_one, fast_sigmoid)
    else:
        part, body_rows = _run_body(x2, y2, rows_avail, min_rows, 1,
                                    pw, pw_is_one, fast_sigmoid)

    # Single cross-lane reduction of the tiny (n_cores, 3, 8, 128) partials.
    bce_sum = jnp.sum(part[:, 0])
    inter_sum = jnp.sum(part[:, 1])
    denom_sum = jnp.sum(part[:, 2])

    if rows >= min_rows:
        n_body = body_rows * LANES
        if n_body < n:
            tail_x = x[n_body:]
            tail_y = y[n_body:]

    if tail_x is not None:
        tb, ti, td = _tail_sums(tail_x.astype(jnp.float32),
                                tail_y.astype(jnp.float32), pw)
        bce_sum = bce_sum + tb
        inter_sum = inter_sum + ti
        denom_sum = denom_sum + td

    bce_mean = bce_sum / jnp.float32(n)
    dice = 1.0 - (2.0 * inter_sum + smooth) / (denom_sum + smooth)
    ce_loss = weight_bce * bce_mean
    dice_loss = weight_dice * dice
    # Matches the PyTorch module: only the dice term is divided by the weight sum.
    return ce_loss + dice_loss / (weight_bce + weight_dice)


def _reference_loss(output, target, weight_bce=1.0, weight_dice=1.0,
                    pos_weight=1.0, smooth=1.0):
    x = output.astype(jnp.float32)
    y = target.astype(jnp.float32)
    sp = jnp.maximum(x, 0.0) + jnp.log1p(jnp.exp(-jnp.abs(x)))
    bce = jnp.mean(pos_weight * y * (sp - x) + (1.0 - y) * sp)
    sig = jax.nn.sigmoid(x)
    inter = jnp.sum(sig * y)
    dice = 1.0 - (2.0 * inter + smooth) / (jnp.sum(sig) + jnp.sum(y) + smooth)
    return weight_bce * bce + (weight_dice * dice) / (weight_bce + weight_dice)


if __name__ == "__main__":
    key = jax.random.PRNGKey(0)
    k1, k2, k3, k4 = jax.random.split(key, 4)

    # Case 1: small segmentation-style logits + float targets (single tile).
    out1 = jax.random.normal(k1, (2, 4, 16, 16), dtype=jnp.float32)
    tgt1 = (jax.random.uniform(k2, (2, 4, 16, 16)) > 0.5).astype(jnp.float32)
    loss1 = jax.block_until_ready(ce_dice_combine_loss(out1, tgt1))
    ref1 = _reference_loss(out1, tgt1)
    assert np.allclose(np.asarray(loss1), np.asarray(ref1), rtol=1e-5, atol=1e-5), (
        f"case1 mismatch: {loss1} vs {ref1}")

    # Case 2: multi-tile body, int8-streamed boolean masks, pos_weight != 1.
    out2 = jax.random.normal(k3, (2, 4, 192, 192), dtype=jnp.float32)
    tgt2 = jax.random.uniform(k4, (2, 4, 192, 192)) > 0.5
    loss2 = jax.block_until_ready(
        ce_dice_combine_loss(out2, tgt2, weight_bce=0.6, weight_dice=0.4,
                             pos_weight=2.0))
    ref2 = _reference_loss(out2, tgt2, weight_bce=0.6, weight_dice=0.4,
                           pos_weight=2.0)
    assert np.allclose(np.asarray(loss2), np.asarray(ref2), rtol=1e-4, atol=1e-5), (
        f"case2 mismatch: {loss2} vs {ref2}")

    print("KERNEL_OK")
</pallas_src>

<mosaic_0001>
module attributes {stable_mosaic.version = 11 : i64} {
  func.func @_partial_sums_kernel(%arg0: i32, %arg1: i32, %arg2: memref<16x128xf32, #tpu.memory_space<vmem>>, %arg3: memref<16x128xf32, #tpu.memory_space<vmem>>, %arg4: memref<1x3x8x128xf32, #tpu.memory_space<vmem>>) attributes {dimension_semantics = [#tpu.dimension_semantics<arbitrary>, #tpu.dimension_semantics<arbitrary>], iteration_bounds = array<i64: 1, 1>, scalar_prefetch = 0 : i64, scratch_operands = 0 : i64, tpu.core_type = #tpu.core_type<tc>, window_params = [{transform_indices = @transform_0, window_bounds = array<i64: 16, 128>}, {transform_indices = @transform_1, window_bounds = array<i64: 16, 128>}, {transform_indices = @transform_2, window_bounds = array<i64: 1, 3, 8, 128>}]} {
    %c0_i32 = arith.constant 0 : i32
    %0 = arith.cmpi eq, %arg1, %c0_i32 : i32
    %1 = arith.extui %0 : i1 to i32
    %c0_i32_0 = arith.constant 0 : i32
    %2 = arith.cmpi ne, %1, %c0_i32_0 : i32
    scf.if %2 {
      %cst_33 = arith.constant 0.000000e+00 : f32
      %48 = vector.broadcast %cst_33 : f32 to vector<3x8x128xf32>
      %c0_34 = arith.constant 0 : index
      %c0_35 = arith.constant 0 : index
      %c0_36 = arith.constant 0 : index
      %c0_37 = arith.constant 0 : index
      %49 = vector.load %arg4[%c0_34, %c0_35, %c0_36, %c0_37] : memref<1x3x8x128xf32, #tpu.memory_space<vmem>>, vector<1x3x8x128xf32>
      %50 = vector.shape_cast %49 : vector<1x3x8x128xf32> to vector<3x8x128xf32>
      %51 = vector.shape_cast %48 : vector<3x8x128xf32> to vector<1x3x8x128xf32>
      tpu.vector_store %arg4[%c0_34, %c0_35, %c0_36, %c0_37], %51 {strides = array<i32>} : memref<1x3x8x128xf32, #tpu.memory_space<vmem>>, vector<1x3x8x128xf32>,
    } else {
    }
    %c0 = arith.constant 0 : index
    %c0_1 = arith.constant 0 : index
    %3 = vector.load %arg2[%c0, %c0_1] : memref<16x128xf32, #tpu.memory_space<vmem>>, vector<16x128xf32>
    %c0_2 = arith.constant 0 : index
    %c0_3 = arith.constant 0 : index
    %4 = vector.load %arg3[%c0_2, %c0_3] : memref<16x128xf32, #tpu.memory_space<vmem>>, vector<16x128xf32>
    %5 = math.absf %3 : vector<16x128xf32>
    %cst = arith.constant 0.000000e+00 : f32
    %6 = vector.broadcast %cst : f32 to vector<16x128xf32>
    %7 = arith.subf %6, %5 : vector<16x128xf32>
    %8 = math.exp %7 : vector<16x128xf32>
    %9 = math.log1p %8 : vector<16x128xf32>
    %cst_4 = arith.constant 0.000000e+00 : f32
    %10 = vector.broadcast %cst_4 : f32 to vector<16x128xf32>
    %11 = arith.maximumf %3, %10 : vector<16x128xf32>
    %12 = arith.addf %11, %9 : vector<16x128xf32>
    %13 = arith.mulf %3, %4 : vector<16x128xf32>
    %14 = arith.subf %12, %13 : vector<16x128xf32>
    %cst_5 = arith.constant 0.000000e+00 : f32
    %15 = vector.broadcast %cst_5 : f32 to vector<16x128xf32>
    %16 = arith.cmpf oge, %3, %15 : vector<16x128xf32>
    %cst_6 = arith.constant 1.000000e+00 : f32
    %17 = vector.broadcast %cst_6 : f32 to vector<16x128xf32>
    %18 = arith.select %16, %17, %8 : vector<16x128xi1>, vector<16x128xf32>
    %cst_7 = arith.constant 1.000000e+00 : f32
    %19 = vector.broadcast %cst_7 : f32 to vector<16x128xf32>
    %20 = arith.addf %19, %8 : vector<16x128xf32>
    %21 = arith.divf %18, %20 : vector<16x128xf32>
    %c0_8 = arith.constant 0 : index
    %c0_9 = arith.constant 0 : index
    %c0_10 = arith.constant 0 : index
    %c0_11 = arith.constant 0 : index
    %22 = vector.load %arg4[%c0_8, %c0_9, %c0_10, %c0_11] : memref<1x3x8x128xf32, #tpu.memory_space<vmem>>, vector<1x1x8x128xf32>
    %23 = vector.shape_cast %22 : vector<1x1x8x128xf32> to vector<8x128xf32>
    %24 = vector.shape_cast %14 : vector<16x128xf32> to vector<2x8x128xf32>
    %cst_12 = arith.constant dense<0.000000e+00> : vector<8x128xf32>
    %25 = vector.multi_reduction <add>, %24, %cst_12 [0] : vector<2x8x128xf32> to vector<8x128xf32>
    %26 = arith.addf %23, %25 : vector<8x128xf32>
    %c0_13 = arith.constant 0 : index
    %c0_14 = arith.constant 0 : index
    %c0_15 = arith.constant 0 : index
    %c0_16 = arith.constant 0 : index
    %27 = vector.load %arg4[%c0_13, %c0_14, %c0_15, %c0_16] : memref<1x3x8x128xf32, #tpu.memory_space<vmem>>, vector<1x1x8x128xf32>
    %28 = vector.shape_cast %27 : vector<1x1x8x128xf32> to vector<8x128xf32>
    %29 = vector.shape_cast %26 : vector<8x128xf32> to vector<1x1x8x128xf32>
    tpu.vector_store %arg4[%c0_13, %c0_14, %c0_15, %c0_16], %29 {strides = array<i32>} : memref<1x3x8x128xf32, #tpu.memory_space<vmem>>, vector<1x1x8x128xf32>,
    %30 = arith.mulf %21, %4 : vector<16x128xf32>
    %c0_17 = arith.constant 0 : index
    %c1 = arith.constant 1 : index
    %c0_18 = arith.constant 0 : index
    %c0_19 = arith.constant 0 : index
    %31 = vector.load %arg4[%c0_17, %c1, %c0_18, %c0_19] : memref<1x3x8x128xf32, #tpu.memory_space<vmem>>, vector<1x1x8x128xf32>
    %32 = vector.shape_cast %31 : vector<1x1x8x128xf32> to vector<8x128xf32>
    %33 = vector.shape_cast %30 : vector<16x128xf32> to vector<2x8x128xf32>
    %cst_20 = arith.constant dense<0.000000e+00> : vector<8x128xf32>
    %34 = vector.multi_reduction <add>, %33, %cst_20 [0] : vector<2x8x128xf32> to vector<8x128xf32>
    %35 = arith.addf %32, %34 : vector<8x128xf32>
    %c0_21 = arith.constant 0 : index
    %c1_22 = arith.constant 1 : index
    %c0_23 = arith.constant 0 : index
    %c0_24 = arith.constant 0 : index
    %36 = vector.load %arg4[%c0_21, %c1_22, %c0_23, %c0_24] : memref<1x3x8x128xf32, #tpu.memory_space<vmem>>, vector<1x1x8x128xf32>
    %37 = vector.shape_cast %36 : vector<1x1x8x128xf32> to vector<8x128xf32>
    %38 = vector.shape_cast %35 : vector<8x128xf32> to vector<1x1x8x128xf32>
    tpu.vector_store %arg4[%c0_21, %c1_22, %c0_23, %c0_24], %38 {strides = array<i32>} : memref<1x3x8x128xf32, #tpu.memory_space<vmem>>, vector<1x1x8x128xf32>,
    %39 = arith.addf %21, %4 : vector<16x128xf32>
    %c0_25 = arith.constant 0 : index
    %c2 = arith.constant 2 : index
    %c0_26 = arith.constant 0 : index
    %c0_27 = arith.constant 0 : index
    %40 = vector.load %arg4[%c0_25, %c2, %c0_26, %c0_27] : memref<1x3x8x128xf32, #tpu.memory_space<vmem>>, vector<1x1x8x128xf32>
    %41 = vector.shape_cast %40 : vector<1x1x8x128xf32> to vector<8x128xf32>
    %42 = vector.shape_cast %39 : vector<16x128xf32> to vector<2x8x128xf32>
    %cst_28 = arith.constant dense<0.000000e+00> : vector<8x128xf32>
    %43 = vector.multi_reduction <add>, %42, %cst_28 [0] : vector<2x8x128xf32> to vector<8x128xf32>
    %44 = arith.addf %41, %43 : vector<8x128xf32>
    %c0_29 = arith.constant 0 : index
    %c2_30 = arith.constant 2 : index
    %c0_31 = arith.constant 0 : index
    %c0_32 = arith.constant 0 : index
    %45 = vector.load %arg4[%c0_29, %c2_30, %c0_31, %c0_32] : memref<1x3x8x128xf32, #tpu.memory_space<vmem>>, vector<1x1x8x128xf32>
    %46 = vector.shape_cast %45 : vector<1x1x8x128xf32> to vector<8x128xf32>
    %47 = vector.shape_cast %44 : vector<8x128xf32> to vector<1x1x8x128xf32>
    tpu.vector_store %arg4[%c0_29, %c2_30, %c0_31, %c0_32], %47 {strides = array<i32>} : memref<1x3x8x128xf32, #tpu.memory_space<vmem>>, vector<1x1x8x128xf32>,
    return
  }
  func.func @transform_0(%arg0: i32, %arg1: i32) -> (i32, i32) {
    %c1_i32 = arith.constant 1 : i32
    %0 = arith.muli %arg0, %c1_i32 : i32
    %1 = arith.addi %0, %arg1 : i32
    %c0_i32 = arith.constant 0 : i32
    %c0_i32_0 = arith.constant 0 : i32
    return %1, %c0_i32 : i32, i32
  }
  func.func @transform_1(%arg0: i32, %arg1: i32) -> (i32, i32) {
    %c1_i32 = arith.constant 1 : i32
    %0 = arith.muli %arg0, %c1_i32 : i32
    %1 = arith.addi %0, %arg1 : i32
    %c0_i32 = arith.constant 0 : i32
    %c0_i32_0 = arith.constant 0 : i32
    return %1, %c0_i32 : i32, i32
  }
  func.func @transform_2(%arg0: i32, %arg1: i32) -> (i32, i32, i32, i32) {
    %c0_i32 = arith.constant 0 : i32
    %c0_i32_0 = arith.constant 0 : i32
    %c0_i32_1 = arith.constant 0 : i32
    %c0_i32_2 = arith.constant 0 : i32
    return %arg0, %c0_i32, %c0_i32_0, %c0_i32_1 : i32, i32, i32, i32
  }
}

</mosaic_0001>

<bundles_post_ra>
// kernel: tpu_custom_call.1
= control target key start
LH: loop header
LB: loop body
LE: loop exit
PB: predicated region body
PF: predicated region fallthrough
CT: control target
= control target key end

     0   :  { %7 = vsyncpa [#allocation3], 0  ;;  %s335_s0 = inlined_call_operand.hbm [shape: f32[16,128], index: 0, kind: input, shape index: {}]   ;;  %s336_s1 = inlined_call_operand.hbm [shape: f32[16,128], index: 1, kind: input, shape index: {}]   ;;  %s337_s2 = inlined_call_operand.hbm [shape: f32[1,3,8,128], index: 2, kind: output, shape index: {}]  }
   0x1   :  { %8 = vsyncpa [#allocation6], 0 }
   0x2   :  { %9 = vsyncpa [#allocation4], 0  ;;  %s18_s11 = sshll.u32 %s335_s0, 4  ;;  %s271_s12 = smov [#allocation2]   ;;  %s19_s11 = int_to_ptr.hbm [resolvable:$true] %s18_s11 }
   0x3   :  { %s20_s13 = sshll.u32 %s271_s12, 4  ;;  %s35_s16 = sshll.u32 %s336_s1, 4  ;;  %s21_s13 = int_to_ptr.vmem [resolvable:$true] %s20_s13  ;;  %s36_s16 = int_to_ptr.hbm [resolvable:$true] %s35_s16 }
   0x4   :  { %s272_s17 = smov 128   ;;  %s273_s18 = smov 8  }
   0x5   :  { %26 = dma.hbm_to_vmem [thread:$0]  %s19_s11, 256, %s21_s13, [#allocation3], %s272_s17, %s272_s17, %s273_s18  }
   0x6   :  { %s274_s19 = smov [#allocation5]  }
   0x7   :  { %s37_s20 = sshll.u32 %s274_s19, 4  ;;  %s38_s20 = int_to_ptr.vmem [resolvable:$true] %s37_s20 }
   0x8   :  { %43 = dma.hbm_to_vmem [thread:$0]  %s36_s16, 256, %s38_s20, [#allocation6], %s272_s17, %s272_s17, %s273_s18  }
   0x9   :  { %265 = dma.done.wait [#allocation3], 256  }
   0xa   :  { %266 = vsyncadd [#allocation3], 4294967040 }
   0xb   :  { %267 = dma.done.wait [#allocation6], 256  }
   0xc   :  { %268 = vsyncadd [#allocation6], 4294967040  ;;  %v303_v0 = vld [vmem:[#allocation2] sm:$0xff]  ;;  %v305_v1 = vld [vmem:[#allocation2 + $0x8] sm:$0xff]  ;;  %s275_s0 = smov [#allocation7]   ;;  %s161_s23 = sshll.u32 %s337_s2, 4  ;;  %s162_s23 = int_to_ptr.hbm [resolvable:$true] %s161_s23 }
   0xd   :  { %v67_v2 = vand.u32 2147483647, %v303_v0  ;;  %v68_v3 = vand.u32 2147483647, %v305_v1  ;;  %v65_v18 = vld [vmem:[#allocation5] sm:$0xff]  ;;  %v66_v19 = vld [vmem:[#allocation5 + $0x8] sm:$0xff] }
   0xe   :  { %v93_v24 = vmax.f32 %v303_v0, 0.0  ;;  %v94_v28 = vmax.f32 %v305_v1, 0.0  ;;  %v97_v31 = vmul.f32 %v65_v18, %v303_v0  ;;  %v98_v32 = vmul.f32 %v66_v19, %v305_v1  ;;  %s159_s1 = sshll.u32 %s275_s0, 4  ;;  %s160_s1 = int_to_ptr.vmem [resolvable:$true] %s159_s1 }
   0xf   :  { %v69_v4 = vsub.f32 0.0, %v67_v2  ;;  %v70_v5 = vsub.f32 0.0, %v68_v3  ;;  %vm101_vm6 = vcmp.ge.f32.partialorder %v303_v0, 0.0  ;;  %vm102_vm7 = vcmp.ge.f32.partialorder %v305_v1, 0.0 }
  0x11   :  { %v71_v6 = vmul.f32 1.442695, %v69_v4  ;;  %v73_v7 = vmul.f32 1.442695, %v70_v5 }
  0x13   :  { %181 = vpow2.f32 %v71_v6 }
  0x14   :  { %183 = vpow2.f32 %v73_v7 }
  0x19   :  { %v182_v8 = vpop.eup %181 }
  0x1a   :  { %v184_v9 = vpop.eup %183  ;;  %v75_v10 = vadd.f32 1.0, %v182_v8  ;;  %v78_v11 = vmul.f32 -0.5, %v182_v8  ;;  %v81_v15 = vand.u32 2147483647, %v182_v8  ;;  %v103_v54 = vsel %vm101_vm6, 1.0, %v182_v8 }
  0x1b   :  { %v84_v12 = vadd.f32 1.0, %v184_v9  ;;  %v87_v13 = vmul.f32 -0.5, %v184_v9  ;;  %v90_v17 = vand.u32 2147483647, %v184_v9  ;;  %v104_v56 = vsel %vm102_vm7, 1.0, %v184_v9 }
  0x1c   :  { %185 = vlog2.f32 %v75_v10  ;;  %v79_v14 = vadd.f32 1.0, %v78_v11  ;;  %vm309_vm0 = vcmp.lt.f32.partialorder %v81_v15, 0.0004427343  ;;  %vm112_vm2 = vweird.f32 %v75_v10 }
  0x1d   :  { %187 = vlog2.f32 %v84_v12  ;;  %v88_v16 = vadd.f32 1.0, %v87_v13  ;;  %vm314_vm1 = vcmp.lt.f32.partialorder %v90_v17, 0.0004427343  ;;  %v116_v36 = vand.u32 2147483647, %v75_v10 }
  0x1e   :  { %189 = vrcp.f32 %v75_v10  ;;  %v80_v20 = vmul.f32 %v182_v8, %v79_v14  ;;  %v118_v37 = vand.u32 2147483648, %v75_v10  ;;  %vm127_vm3 = vweird.f32 %v84_v12 }
  0x1f   :  { %191 = vrcp.f32 %v84_v12  ;;  %v89_v23 = vmul.f32 %v184_v9, %v88_v16  ;;  %v133_v43 = vand.u32 2147483648, %v84_v12  ;;  %v131_v46 = vand.u32 2147483647, %v84_v12 }
  0x20   :  { %v119_v49 = vor.u32 1.1754944e-38, %v118_v37  ;;  %vm117_vm9 = vcmp.eq.f32.partialorder %v116_v36, 8.507059e+37 }
  0x21   :  { %v134_v53 = vor.u32 1.1754944e-38, %v133_v43  ;;  %vm132_vm11 = vcmp.eq.f32.partialorder %v131_v46, 8.507059e+37 }
  0x22   :  { %v186_v21 = vpop.eup %185 }
  0x23   :  { %v188_v25 = vpop.eup %187  ;;  %v77_v26 = vmul.f32 0.6931472, %v186_v21 }
  0x24   :  { %v190_v29 = vpop.eup %189  ;;  %v86_v30 = vmul.f32 0.6931472, %v188_v25 }
  0x25   :  { %v192_v33 = vpop.eup %191  ;;  %v83_v34 = vsel %vm309_vm0, %v80_v20, %v77_v26  ;;  %v108_v35 = vmul.f32 %v190_v29, %v75_v10  ;;  %vm113_vm4 = vweird.f32 %v190_v29 }
  0x26   :  { %v92_v38 = vsel %vm314_vm1, %v89_v23, %v86_v30  ;;  %v95_v39 = vadd.f32 %v93_v24, %v83_v34  ;;  %v123_v40 = vmul.f32 %v192_v33, %v84_v12  ;;  %vm128_vm5 = vweird.f32 %v192_v33  ;;  %vm114_vm8 = vmor %vm112_vm2, %vm113_vm4 }
  0x27   :  { %v96_v41 = vadd.f32 %v94_v28, %v92_v38  ;;  %v109_v42 = vsub.f32 1.0, %v108_v35  ;;  %vm129_vm10 = vmor %vm127_vm3, %vm128_vm5 }
  0x28   :  { %v99_v44 = vsub.f32 %v95_v39, %v97_v31  ;;  %v124_v45 = vsub.f32 1.0, %v123_v40 }
  0x29   :  { %v100_v47 = vsub.f32 %v96_v41, %v98_v32  ;;  %v110_v48 = vmul.f32 %v190_v29, %v109_v42 }
  0x2a   :  { %v125_v50 = vmul.f32 %v192_v33, %v124_v45 }
  0x2b   :  { %v138_v51 = vadd.f32 %v100_v47, %v99_v44  ;;  %v111_v52 = vadd.f32 %v190_v29, %v110_v48 }
  0x2c   :  { %v126_v55 = vadd.f32 %v192_v33, %v125_v50 }
  0x2d   :  { %v115_v57 = vsel %vm114_vm8, %v190_v29, %v111_v52  ;;  %140 = vst [vmem:[#allocation7] sm:$0xff] %v138_v51 }
  0x2e   :  { %v120_v58 = vsel %vm117_vm9, %v119_v49, %v115_v57  ;;  %v130_v59 = vsel %vm129_vm10, %v192_v33, %v126_v55 }
  0x2f   :  { %v121_v60 = vmul.f32 %v120_v58, %v103_v54  ;;  %v135_v61 = vsel %vm132_vm11, %v134_v53, %v130_v59 }
  0x30   :  { %v136_v62 = vmul.f32 %v135_v61, %v104_v56 }
  0x31   :  { %v141_v63 = vmul.f32 %v121_v60, %v65_v18  ;;  %v148_v0 = vadd.f32 %v121_v60, %v65_v18 }
  0x32   :  { %v142_v1 = vmul.f32 %v136_v62, %v66_v19  ;;  %v149_v2 = vadd.f32 %v136_v62, %v66_v19 }
  0x34   :  { %v145_v3 = vadd.f32 %v142_v1, %v141_v63  ;;  %v152_v4 = vadd.f32 %v149_v2, %v148_v0 }
  0x36   :  { %147 = vst [vmem:[#allocation7 + $0x8] sm:$0xff] %v145_v3 }
  0x37   :  { %154 = vst [vmem:[#allocation7 + $0x10] sm:$0xff] %v152_v4 }
  0x38   :  { %167 = dma.vmem_to_hbm [thread:$0]  %s160_s1, 384, %s162_s23, [#allocation4], %s272_s17, %s272_s17, %s273_s18  }
  0x39   :  { %269 = dma.done.wait [#allocation4], 384  }
  0x3a   :  { %270 = vsyncadd [#allocation4], 4294966912 }
  0x3b   :  { %172 = vsyncpa [#allocation3], 1 }
  0x3c   :  { %173 = vsyncpa [#allocation6], 1 }
  0x3d   :  { %174 = vsyncpa [#allocation4], 1 }

</bundles_post_ra>
